<compile_context>
chip_gen: v7x
topology: tpu7x:2x2x1
jax: 0.10.0
libtpu: 0.0.40
codegen_flags: <defaults>
</compile_context>

<pallas_src>
import jax
import jax.numpy as jnp
from jax.experimental import pallas as pl
from jax.experimental.pallas import tpu as pltpu


# ----------------------------------------------------------------------------- kernel
def _bahdanau_kernel(enc_ref, mask_ref, bias_ref, w1_ref, vw_ref, out_ref):
    si = pl.program_id(1)
    n_s = pl.num_programs(1)
    tile_b, tile_s, hidden = enc_ref.shape

    # ---- hot loop: one bf16 MXU matmul + bias add + EUP tanh + lane reduce ----
    x = enc_ref[...].reshape(tile_b * tile_s, hidden)                   # bf16, free reshape
    w1e = jnp.dot(x, w1_ref[...], preferred_element_type=jnp.float32)   # (R, H) f32
    w1e = w1e.reshape(tile_b, tile_s, hidden)
    t = jnp.tanh(w1e + bias_ref[...])            # (tile_b, 1, H) sublane-broadcast
    # V projection on the VPU/XLU; V's bias shifts every score equally and
    # cancels exactly in the softmax, so it is dropped.
    sc = jnp.sum(t * vw_ref[...], axis=-1)       # (tile_b, tile_s) f32
    out_ref[si] = sc                             # lane-dense, leading-dim dynamic store

    # ---- finalize: masked softmax over the whole seq axis, on the resident block ----
    @pl.when(si == n_s - 1)
    def _finalize():
        scores = out_ref[...]                                            # (n_s, tile_b, tile_s)
        scores = jnp.where(mask_ref[...] != 0.0, scores, jnp.float32(-1e18))
        m = jnp.max(scores, axis=2, keepdims=True)                       # lane reduce
        m = jnp.max(m, axis=0, keepdims=True)                            # across seq chunks
        e = jnp.exp(scores - m)
        l = jnp.sum(e, axis=2, keepdims=True)
        l = jnp.sum(l, axis=0, keepdims=True)                            # (1, tile_b, 1)
        out_ref[...] = e / l


# ----------------------------------------------------------------------------- helpers
def _round_up(x, m):
    return ((x + m - 1) // m) * m


def _vmem_capacity_bytes():
    try:
        return int(pltpu.get_tpu_info().vmem_capacity_bytes)
    except Exception:
        return 64 * 1024 * 1024          # conservative (v7x per-TensorCore VMEM)


def _choose_batch_tile(batch, max_batch_tile):
    """Multiple-of-8 divisor of batch (sublane-aligned second-minor dim), else full batch."""
    if batch >= 16:
        # Leave >=2 batch tiles so the "parallel" axis can shard across v7x's 2 TCs.
        max_batch_tile = min(max_batch_tile, batch // 2)
    best = None
    tb = 8
    while tb <= min(batch, max_batch_tile):
        if batch % tb == 0:
            best = tb
        tb += 8
    return best if best is not None else batch


def _choose_seq_tile(seq, tile_b, max_rows):
    """Largest multiple-of-16 divisor of seq (bf16 sublane packing) fitting the row budget."""
    best = None
    ts = 16
    while ts <= seq:
        if tile_b * ts > max_rows:
            break
        if seq % ts == 0:
            best = ts
        ts += 16
    # Fallback: full seq per step (block dim == array dim is always legal).
    return best if best is not None else seq


# ----------------------------------------------------------------------------- wrapper
def bahdanau_attention(h_state, enc_outputs, mask, params, *,
                       max_rows_per_block=512, max_batch_tile=64):
    """h_state: (L, B, H), enc_outputs: (S, B, H), mask: (S, B, 1) (bool/float) or None.

    Returns attention weights of shape (S, B, 1), softmaxed over the seq axis.
    On 128 MiB parts (v5e/v6e) `max_rows_per_block` can be raised to 1024-2048.
    """
    seq, batch, hidden = enc_outputs.shape
    if h_state.shape[-1] != hidden:
        raise ValueError("Hidden size does not match.")

    # ---- wrapper-side layout plumbing (HBM-side, handled by XLA) ----
    # Sum over RNN layers (identity when n_layers == 1, matching torch).
    h = jnp.sum(h_state.astype(jnp.float32), axis=0)                          # (B, H)
    # Seq-invariant projection hoisted out of the kernel: W2 h + b2 + b1.
    bias = (h @ params["w2"].astype(jnp.float32)
            + params["b2"] + params["b1"]).reshape(batch, 1, hidden)          # (B, 1, H)
    # bf16 MXU operands (f32 accumulation happens in-kernel).
    enc_bsh = jnp.transpose(enc_outputs, (1, 0, 2)).astype(jnp.bfloat16)      # (B, S, H)
    w1 = params["w1"].astype(jnp.bfloat16)                                    # (H, H)
    vw = params["vw"].astype(jnp.float32).reshape(1, 1, hidden)               # (1, 1, H)
    if mask is None:
        mask_sb = jnp.ones((seq, batch), jnp.float32)
    else:
        mask_sb = mask.reshape(seq, batch).astype(jnp.float32)

    # ---- tiling ----
    tile_b = _choose_batch_tile(batch, max_batch_tile)
    tile_s = _choose_seq_tile(seq, tile_b, max_rows_per_block)
    assert batch % tile_b == 0 and seq % tile_s == 0
    n_b, n_s = batch // tile_b, seq // tile_s

    # Lane-dense mask, laid out to match the (n_s, B, tile_s) output.
    mask_3d = jnp.transpose(mask_sb.reshape(n_s, tile_s, batch), (0, 2, 1))   # (n_s, B, tile_s)

    grid_spec = pltpu.PrefetchScalarGridSpec(
        num_scalar_prefetch=0,
        grid=(n_b, n_s),
        in_specs=[
            pl.BlockSpec((tile_b, tile_s, hidden), lambda bi, si: (bi, si, 0)),  # enc (pipelined)
            pl.BlockSpec((n_s, tile_b, tile_s), lambda bi, si: (0, bi, 0)),      # mask (per batch tile)
            pl.BlockSpec((tile_b, 1, hidden), lambda bi, si: (bi, 0, 0)),        # folded bias
            pl.BlockSpec((hidden, hidden), lambda bi, si: (0, 0)),               # W1 (bf16)
            pl.BlockSpec((1, 1, hidden), lambda bi, si: (0, 0, 0)),              # V weight
        ],
        # Resident across the seq-chunk axis: raw scores accumulate here, become
        # the attention weights at the final step of each batch tile.
        out_specs=pl.BlockSpec((n_s, tile_b, tile_s), lambda bi, si: (0, bi, 0)),
    )

    # ---- generation-aware VMEM budget ----
    s_lane = _round_up(tile_s, 128)
    h_lane = _round_up(hidden, 128)
    tb_pad = _round_up(tile_b, 8)
    est = (
        2 * tile_b * _round_up(tile_s, 16) * h_lane * 2      # enc blocks (bf16, double-buffered)
        + 2 * _round_up(hidden, 16) * h_lane * 2             # W1 (bf16)
        + 4 * n_s * tb_pad * s_lane * 4                      # mask + resident output blocks
        + 2 * tile_b * 8 * h_lane * 4                        # bias (tile_b, 1, H)
        + 2 * 8 * h_lane * 4                                 # V weight row
        + 6 * tile_b * _round_up(tile_s, 8) * h_lane * 4     # f32 working set (w1e / tanh)
        + 4 * n_s * tb_pad * s_lane * 4                      # finalize temporaries
    )
    cap = _vmem_capacity_bytes()
    vmem_limit = max(2 * est + (8 << 20), 32 << 20)
    vmem_limit = min(vmem_limit, int(cap * 0.85))
    vmem_limit = int(max(vmem_limit, min(est + (4 << 20), int(cap * 0.95))))

    cost = pl.CostEstimate(
        flops=2 * seq * batch * hidden * hidden + 4 * seq * batch * hidden + 6 * seq * batch,
        transcendentals=seq * batch * hidden + seq * batch,
        bytes_accessed=(2 * seq * batch * hidden + 2 * hidden * hidden
                        + 4 * (2 * batch * seq + batch * hidden + hidden)),
    )

    out = pl.pallas_call(
        _bahdanau_kernel,
        out_shape=jax.ShapeDtypeStruct((n_s, batch, tile_s), jnp.float32),
        grid_spec=grid_spec,
        compiler_params=pltpu.CompilerParams(
            dimension_semantics=("parallel", "arbitrary"),
            vmem_limit_bytes=vmem_limit),
        cost_estimate=cost,
    )(enc_bsh, mask_3d, bias, w1, vw)

    # (n_s, B, tile_s) -> (S, B, 1): wrapper-side layout plumbing.
    return jnp.transpose(out, (0, 2, 1)).reshape(seq, batch)[:, :, None]


# ----------------------------------------------------------------------------- params / reference
def init_params(key, hidden_size):
    k1, k2, k3, k4, k5, k6 = jax.random.split(key, 6)
    scale = 0.1
    # W1/W2 stored pre-transposed as [in, out] (torch Linear is y = x @ W.T + b);
    # V's weight kept in torch layout (1, H); V's bias cancels in the softmax and
    # is only used by the pure-JAX reference.
    return {
        "w1": scale * jax.random.normal(k1, (hidden_size, hidden_size), jnp.float32),
        "b1": scale * jax.random.normal(k2, (1, hidden_size), jnp.float32),
        "w2": scale * jax.random.normal(k3, (hidden_size, hidden_size), jnp.float32),
        "b2": scale * jax.random.normal(k4, (1, hidden_size), jnp.float32),
        "vw": scale * jax.random.normal(k5, (1, hidden_size), jnp.float32),
        "vb": scale * jax.random.normal(k6, (1, 1), jnp.float32),
    }


def reference(h_state, enc_outputs, mask, params):
    """Pure-JAX f32 reference mirroring the PyTorch forward."""
    h = h_state
    if h.shape[0] > 1:
        h = jnp.sum(h, axis=0, keepdims=True)                               # (1, B, H)
    w1e = enc_outputs @ params["w1"] + params["b1"][0]                      # (S, B, H)
    w2h = h @ params["w2"] + params["b2"][0]                                # (1, B, H)
    scores = jnp.tanh(w1e + w2h) @ params["vw"].T + params["vb"][0, 0]      # (S, B, 1)
    if mask is not None:
        scores = jnp.where(mask != 0.0, scores, jnp.float32(-1e18))
    return jax.nn.softmax(scores, axis=0)


# ----------------------------------------------------------------------------- demo
if __name__ == "__main__":
    SEQ, BATCH, HIDDEN, N_LAYERS = 64, 8, 128, 2

    key = jax.random.PRNGKey(0)
    kp, ke, kh, km = jax.random.split(key, 4)

    params = init_params(kp, HIDDEN)
    enc_outputs = jax.random.normal(ke, (SEQ, BATCH, HIDDEN), jnp.float32)
    h_state = jax.random.normal(kh, (N_LAYERS, BATCH, HIDDEN), jnp.float32)
    mask = (jax.random.uniform(km, (SEQ, BATCH, 1)) > 0.2).astype(jnp.float32)

    # Small row budget so this tiny demo still exercises a multi-chunk, pipelined
    # seq grid (4 chunks of 16 seq steps each) plus the resident-block finalize.
    out = bahdanau_attention(h_state, enc_outputs, mask, params,
                             max_rows_per_block=128)
    out = jax.block_until_ready(out)

    ref = reference(h_state, enc_outputs, mask, params)
    assert out.shape == (SEQ, BATCH, 1)
    max_err = float(jnp.max(jnp.abs(out - ref)))
    # bf16 MXU operands vs. a pure-f32 reference -> relaxed tolerance.
    assert max_err < 2e-2, f"max err {max_err}"
    # attention weights sum to 1 over the seq axis
    assert jnp.allclose(jnp.sum(out, axis=0), 1.0, atol=1e-4)

    print("KERNEL_OK")
</pallas_src>

<mosaic_0001>
module attributes {stable_mosaic.version = 11 : i64} {
  func.func @_bahdanau_kernel(%arg0: i32, %arg1: i32, %arg2: memref<8x16x128xbf16, #tpu.memory_space<vmem>>, %arg3: memref<4x8x16xf32, #tpu.memory_space<vmem>>, %arg4: memref<8x1x128xf32, #tpu.memory_space<vmem>>, %arg5: memref<128x128xbf16, #tpu.memory_space<vmem>>, %arg6: memref<1x1x128xf32, #tpu.memory_space<vmem>>, %arg7: memref<4x8x16xf32, #tpu.memory_space<vmem>>) attributes {dimension_semantics = [#tpu.dimension_semantics<parallel>, #tpu.dimension_semantics<arbitrary>], iteration_bounds = array<i64: 1, 4>, scalar_prefetch = 0 : i64, scratch_operands = 0 : i64, tpu.core_type = #tpu.core_type<tc>, window_params = [{transform_indices = @transform_0, window_bounds = array<i64: 8, 16, 128>}, {transform_indices = @transform_1, window_bounds = array<i64: 4, 8, 16>}, {transform_indices = @transform_2, window_bounds = array<i64: 8, 1, 128>}, {pipeline_mode = #tpu.pipeline_mode<synchronous>, transform_indices = @transform_3, window_bounds = array<i64: 128, 128>}, {pipeline_mode = #tpu.pipeline_mode<synchronous>, transform_indices = @transform_4, window_bounds = array<i64: 1, 1, 128>}, {transform_indices = @transform_5, window_bounds = array<i64: 4, 8, 16>}]} {
    %c0 = arith.constant 0 : index
    %c0_0 = arith.constant 0 : index
    %c0_1 = arith.constant 0 : index
    %0 = vector.load %arg2[%c0, %c0_0, %c0_1] : memref<8x16x128xbf16, #tpu.memory_space<vmem>>, vector<8x16x128xbf16>
    %1 = vector.shape_cast %0 : vector<8x16x128xbf16> to vector<128x128xbf16>
    %c0_2 = arith.constant 0 : index
    %c0_3 = arith.constant 0 : index
    %2 = vector.load %arg5[%c0_2, %c0_3] : memref<128x128xbf16, #tpu.memory_space<vmem>>, vector<128x128xbf16>
    %cst = arith.constant dense<0.000000e+00> : vector<128x128xf32>
    %3 = tpu.matmul %1, %2, %cst {dimension_numbers = #tpu.dot_dimension_numbers<[1], [0], [0], [1], [0, 0, 1, 1], [], []>} : vector<128x128xbf16>, vector<128x128xbf16>, vector<128x128xf32> -> vector<128x128xf32>
    %4 = vector.shape_cast %3 : vector<128x128xf32> to vector<8x16x128xf32>
    %c0_4 = arith.constant 0 : index
    %c0_5 = arith.constant 0 : index
    %c0_6 = arith.constant 0 : index
    %5 = vector.load %arg4[%c0_4, %c0_5, %c0_6] : memref<8x1x128xf32, #tpu.memory_space<vmem>>, vector<8x1x128xf32>
    %6 = vector.broadcast %5 : vector<8x1x128xf32> to vector<8x16x128xf32>
    %7 = arith.addf %4, %6 : vector<8x16x128xf32>
    %8 = math.tanh %7 : vector<8x16x128xf32>
    %c0_7 = arith.constant 0 : index
    %c0_8 = arith.constant 0 : index
    %c0_9 = arith.constant 0 : index
    %9 = vector.load %arg6[%c0_7, %c0_8, %c0_9] : memref<1x1x128xf32, #tpu.memory_space<vmem>>, vector<1x1x128xf32>
    %10 = vector.broadcast %9 : vector<1x1x128xf32> to vector<8x16x128xf32>
    %11 = arith.mulf %8, %10 : vector<8x16x128xf32>
    %cst_10 = arith.constant dense<0.000000e+00> : vector<8x16xf32>
    %12 = vector.multi_reduction <add>, %11, %cst_10 [2] : vector<8x16x128xf32> to vector<8x16xf32>
    %13 = arith.index_cast %arg1 : i32 to index
    %c0_11 = arith.constant 0 : index
    %c0_12 = arith.constant 0 : index
    %14 = vector.load %arg7[%13, %c0_11, %c0_12] : memref<4x8x16xf32, #tpu.memory_space<vmem>>, vector<1x8x16xf32>
    %15 = vector.shape_cast %14 : vector<1x8x16xf32> to vector<8x16xf32>
    %16 = vector.shape_cast %12 : vector<8x16xf32> to vector<1x8x16xf32>
    tpu.vector_store %arg7[%13, %c0_11, %c0_12], %16 {strides = array<i32>} : memref<4x8x16xf32, #tpu.memory_space<vmem>>, vector<1x8x16xf32>,
    %c3_i32 = arith.constant 3 : i32
    %17 = arith.cmpi eq, %arg1, %c3_i32 : i32
    %18 = arith.extui %17 : i1 to i32
    %c0_i32 = arith.constant 0 : i32
    %19 = arith.cmpi ne, %18, %c0_i32 : i32
    scf.if %19 {
      %c0_13 = arith.constant 0 : index
      %c0_14 = arith.constant 0 : index
      %c0_15 = arith.constant 0 : index
      %20 = vector.load %arg7[%c0_13, %c0_14, %c0_15] : memref<4x8x16xf32, #tpu.memory_space<vmem>>, vector<4x8x16xf32>
      %c0_16 = arith.constant 0 : index
      %c0_17 = arith.constant 0 : index
      %c0_18 = arith.constant 0 : index
      %21 = vector.load %arg3[%c0_16, %c0_17, %c0_18] : memref<4x8x16xf32, #tpu.memory_space<vmem>>, vector<4x8x16xf32>
      %cst_19 = arith.constant 0.000000e+00 : f32
      %22 = vector.broadcast %cst_19 : f32 to vector<4x8x16xf32>
      %23 = arith.cmpf one, %21, %22 : vector<4x8x16xf32>
      %cst_20 = arith.constant -9.99999984E+17 : f32
      %24 = vector.broadcast %cst_20 : f32 to vector<4x8x16xf32>
      %25 = arith.select %23, %20, %24 : vector<4x8x16xi1>, vector<4x8x16xf32>
      %cst_21 = arith.constant dense<0xFF800000> : vector<4x8xf32>
      %26 = vector.multi_reduction <maximumf>, %25, %cst_21 [2] : vector<4x8x16xf32> to vector<4x8xf32>
      %27 = vector.shape_cast %26 : vector<4x8xf32> to vector<4x8x1xf32>
      %cst_22 = arith.constant dense<0xFF800000> : vector<8x1xf32>
      %28 = vector.multi_reduction <maximumf>, %27, %cst_22 [0] : vector<4x8x1xf32> to vector<8x1xf32>
      %29 = vector.shape_cast %28 : vector<8x1xf32> to vector<1x8x1xf32>
      %30 = vector.broadcast %29 : vector<1x8x1xf32> to vector<4x8x16xf32>
      %31 = arith.subf %25, %30 : vector<4x8x16xf32>
      %32 = math.exp %31 : vector<4x8x16xf32>
      %cst_23 = arith.constant dense<0.000000e+00> : vector<4x8xf32>
      %33 = vector.multi_reduction <add>, %32, %cst_23 [2] : vector<4x8x16xf32> to vector<4x8xf32>
      %34 = vector.shape_cast %33 : vector<4x8xf32> to vector<4x8x1xf32>
      %cst_24 = arith.constant dense<0.000000e+00> : vector<8x1xf32>
      %35 = vector.multi_reduction <add>, %34, %cst_24 [0] : vector<4x8x1xf32> to vector<8x1xf32>
      %36 = vector.shape_cast %35 : vector<8x1xf32> to vector<1x8x1xf32>
      %37 = vector.broadcast %36 : vector<1x8x1xf32> to vector<4x8x16xf32>
      %38 = arith.divf %32, %37 : vector<4x8x16xf32>
      %c0_25 = arith.constant 0 : index
      %c0_26 = arith.constant 0 : index
      %c0_27 = arith.constant 0 : index
      %39 = vector.load %arg7[%c0_25, %c0_26, %c0_27] : memref<4x8x16xf32, #tpu.memory_space<vmem>>, vector<4x8x16xf32>
      tpu.vector_store %arg7[%c0_25, %c0_26, %c0_27], %38 {strides = array<i32>} : memref<4x8x16xf32, #tpu.memory_space<vmem>>, vector<4x8x16xf32>,
    } else {
    }
    return
  }
  func.func @transform_0(%arg0: i32, %arg1: i32) -> (i32, i32, i32) {
    %c0_i32 = arith.constant 0 : i32
    %c0_i32_0 = arith.constant 0 : i32
    return %arg0, %arg1, %c0_i32 : i32, i32, i32
  }
  func.func @transform_1(%arg0: i32, %arg1: i32) -> (i32, i32, i32) {
    %c0_i32 = arith.constant 0 : i32
    %c0_i32_0 = arith.constant 0 : i32
    %c0_i32_1 = arith.constant 0 : i32
    return %c0_i32, %arg0, %c0_i32_0 : i32, i32, i32
  }
  func.func @transform_2(%arg0: i32, %arg1: i32) -> (i32, i32, i32) {
    %c0_i32 = arith.constant 0 : i32
    %c0_i32_0 = arith.constant 0 : i32
    %c0_i32_1 = arith.constant 0 : i32
    return %arg0, %c0_i32, %c0_i32_0 : i32, i32, i32
  }
  func.func @transform_3(%arg0: i32, %arg1: i32) -> (i32, i32) {
    %c0_i32 = arith.constant 0 : i32
    %c0_i32_0 = arith.constant 0 : i32
    %c0_i32_1 = arith.constant 0 : i32
    return %c0_i32, %c0_i32_0 : i32, i32
  }
  func.func @transform_4(%arg0: i32, %arg1: i32) -> (i32, i32, i32) {
    %c0_i32 = arith.constant 0 : i32
    %c0_i32_0 = arith.constant 0 : i32
    %c0_i32_1 = arith.constant 0 : i32
    %c0_i32_2 = arith.constant 0 : i32
    return %c0_i32, %c0_i32_0, %c0_i32_1 : i32, i32, i32
  }
  func.func @transform_5(%arg0: i32, %arg1: i32) -> (i32, i32, i32) {
    %c0_i32 = arith.constant 0 : i32
    %c0_i32_0 = arith.constant 0 : i32
    %c0_i32_1 = arith.constant 0 : i32
    return %c0_i32, %arg0, %c0_i32_0 : i32, i32, i32
  }
}

</mosaic_0001>

<bundles_post_ra>
// kernel: tpu_custom_call.1
= control target key start
LH: loop header
LB: loop body
LE: loop exit
PB: predicated region body
PF: predicated region fallthrough
CT: control target
= control target key end

     0   :  { %s1778_s0 = inlined_call_operand.hbm [shape: bf16[8,64,128], index: 0, kind: input, shape index: {}]   ;;  %s1779_s1 = inlined_call_operand.hbm [shape: f32[4,8,16], index: 1, kind: input, shape index: {}]   ;;  %s1780_s2 = inlined_call_operand.hbm [shape: f32[8,1,128], index: 2, kind: input, shape index: {}]   ;;  %s1781_s3 = inlined_call_operand.hbm [shape: bf16[128,128], index: 3, kind: input, shape index: {}]   ;;  %s1782_s4 = inlined_call_operand.vmem [shape: f32[1,1,128], index: 4, kind: input, shape index: {}]   ;;  %s1783_s5 = inlined_call_operand.hbm [shape: f32[4,8,16], index: 5, kind: output, shape index: {}]  }
   0x1   :  { %1791 = sst [smem:[#allocation19_spill]] %s1779_s1 }
   0x2   :  { %10 = vsyncpa [#allocation3], 0 }
   0x3   :  { %12 = vsyncpa [#allocation3 + $0x1], 0 }
   0x4   :  { %13 = vsyncpa [#allocation6], 0 }
   0x5   :  { %14 = vsyncpa [#allocation9], 0 }
   0x6   :  { %15 = vsyncpa [#allocation4], 0  ;;  %s1502_s18 = smov 0   ;;  %s1504_s19 = smov 0  }
   0x7   :  { %s1506_s20 = smov 0   ;;  %s1508_s21 = smov 0  }
   0x8   :  { %s1510_s22 = smov 0   ;;  %s1512_s23 = smov 0  }
   0x9 LB: > { %s1789_s24 = sadd.s32 4294967295, %s1452_s23   ;;  %s30_s25 = sadd.s32 1, %s1448_s22  ;;  %s1452_s23 = sphi %s1512_s23, %s21_s23   ;;  %s1448_s22 = sphi %s1510_s22, %s1811_s22   ;;  %s1444_s21 = sphi %s1508_s21, %s1810_s21   ;;  %s1440_s20 = sphi %s1506_s20, %s1809_s20   ;;  %s1436_s19 = sphi %s1504_s19, %s1808_s19   ;;  %s1432_s18 = sphi %s1502_s18, %s1807_s18  }
   0xa   : > { %p31_p0 = scmp.ge.s32.totalorder %s30_s25, 4  ;;  %s42_s26 = sadd.s32 1, %s1440_s20 }
   0xb   : > { %p49_p1 = scmp.ne.s32.totalorder %s1440_s20, %s1436_s19  ;;  %p50_p2 = scmp.eq.s32.totalorder %s1452_s23, 0 }
   0xc   : > { %s1813_s25 = smov (%p31_p0, %s30_s25), 0  ;;  %p55_p4 = scmp.ne.s32.totalorder %s1436_s19, %s1432_s18 }
   0xd   : > { %1792 = sst [smem:[#allocation18_spill]] %s1813_s25  ;;  %p1538_p3 = por %p50_p2, %p49_p1 }
   0xe   : > { %s38_s28 = ssub.s32 %s1448_s22, %s1813_s25  ;;  %p1547_p5 = scmp.eq.s32.totalorder %s1789_s24, 0 }
   0xf   : > { %s1793_s27 = scalar_select %p1538_p3, 1, 0 }
  0x10   : > { %s1794_s29 = scalar_select %p1547_p5, 1, 0 }
  0x11   : > { %p40_p6 = scmp.eq.s32.totalorder %s38_s28, 0  ;;  %p1002_p7 = scmp.ge.s32.totalorder %s1452_s23, 1 }
  0x12   : > { %p1554_p8 = por %p1547_p5, %p55_p4  ;;  %p186_p9 = scmp.lt.s32.totalorder %s1452_s23, 5 }
  0x13   : > { %s1560_s6 = scalar_select %p40_p6, %s1440_s20, %s42_s26  }
  0x14   : > { %s1795_s30 = scalar_select %p1554_p8, 1, 0 }
  0x15   : > { %p1562_p10 = pnand %p1002_p7, %p186_p9  ;;  %s1454_s8 = smov [#allocation5]  }
  0x16   : > { %s200_s9 = sshll.u32 %s1454_s8, 4  ;;  %s1455_s11 = smov [#allocation7]   ;;  %s201_s9 = int_to_ptr.vmem [resolvable:$true] %s200_s9 }
  0x17   : > { %s1796_s7 = scalar_select %p1562_p10, 1, 0 }
  0x18   : > { %p1138_p11 = pneg %p1562_p10  ;;  %s216_s12 = sshll.u32 %s1455_s11, 4  ;;  %s1574_s12 = int_to_ptr.vmem [resolvable:$true] %s216_s12 }
  0x19   : > { %s1798_s1 = sld [smem:[#allocation19_spill]] }
  0x1a   : > { %p1570_p12 = pnand %p1138_p11, %p1547_p5 }
  0x1c   : > { %p1584_p0 = pneg %p1570_p12 }
  0x1f   : > { %s1280_s15 = scalar_lea.hbm %s1798_s1, 512 }
  0x20   : > { %p1281_p13 = scmp.ne.s32.totalorder %s1798_s1, %s1280_s15  ;;  %p1287_p4 = scmp.lt.u32.totalorder %s1280_s15, %s1798_s1 }
  0x22   : > { %p1283_p1 = pnand %p1584_p0, %p1281_p13 }
  0x24   : > { %p1284_p2 = pneg %p1283_p1 }
  0x26   : > { %p1289_p6 = pnand %p1287_p4, %p1284_p2 }
  0x28   : > { %1292 = shalt.err (!%p1289_p6)
}
  0x29   : > { %s1293_s8 = scalar_lea.vmem %s201_s9, 512  ;;  %p1301_p5 = scmp.lt.s32.totalorder %s201_s9, %s201_s9 }
  0x2a   : > { %p1294_p7 = scmp.ne.s32.totalorder %s201_s9, %s1293_s8  ;;  %p1302_p8 = scmp.lt.s32.totalorder %s1293_s8, %s1293_s8 }
  0x2c   : > { %p1296_p9 = pnand %p1294_p7, %p1584_p0  ;;  %p1303_p10 = por %p1302_p8, %p1301_p5 }
  0x2e   : > { %p1297_p11 = pneg %p1296_p9 }
  0x30   : > { %p1304_p3 = pnand %p1303_p10, %p1297_p11 }
  0x32   : > { %1307 = shalt.err (!%p1304_p3)
}
  0x33   : > { %s1456_s11 = smov 128   ;;  %s1457_s13 = smov 8  }
  0x34   : > { %1141 = dma.hbm_to_vmem [thread:$0]  (!%p1570_p12), %s1798_s1, 512, %s201_s9, [#allocation6], %s1456_s11, %s1456_s11, %s1457_s13  }
  0x35   : > { %s1308_s26 = scalar_lea.hbm %s1780_s2, 128 }
  0x36   : > { %p1309_p13 = scmp.ne.s32.totalorder %s1780_s2, %s1308_s26  ;;  %p1315_p8 = scmp.lt.u32.totalorder %s1308_s26, %s1780_s2 }
  0x38   : > { %p1311_p5 = pnand %p1309_p13, %p1584_p0 }
  0x3a   : > { %p1312_p3 = pneg %p1311_p5 }
  0x3c   : > { %p1317_p10 = pnand %p1315_p8, %p1312_p3 }
  0x3e   : > { %1320 = shalt.err (!%p1317_p10)
}
  0x3f   : > { %s1321_s9 = scalar_lea.vmem %s1574_s12, 128  ;;  %p1329_p6 = scmp.lt.s32.totalorder %s1574_s12, %s1574_s12 }
  0x40   : > { %p1322_p1 = scmp.ne.s32.totalorder %s1574_s12, %s1321_s9  ;;  %p1330_p7 = scmp.lt.s32.totalorder %s1321_s9, %s1321_s9 }
  0x42   : > { %p1324_p2 = pnand %p1322_p1, %p1584_p0  ;;  %p1331_p9 = por %p1330_p7, %p1329_p6 }
  0x44   : > { %p1325_p4 = pneg %p1324_p2 }
  0x46   : > { %p1332_p11 = pnand %p1331_p9, %p1325_p4 }
  0x48   : > { %1335 = shalt.err (!%p1332_p11)
}
  0x49   : > { %s1458_s24 = smov 16   ;;  %s1459_s25 = smov 1  }
  0x4a   : > { %1144 = dma.hbm_to_vmem [thread:$0]  (!%p1570_p12), %s1780_s2, 128, %s1574_s12, [#allocation6], %s1458_s24, %s1458_s24, %s1459_s25  }
  0x4b   : > { %s1460_s14 = smov [#allocation8]   ;;  %s1336_s26 = scalar_lea.hbm %s1781_s3, 1024 }
  0x4c   : > { %s229_s15 = sshll.u32 %s1460_s14, 4  ;;  %p1337_p13 = scmp.ne.s32.totalorder %s1781_s3, %s1336_s26  ;;  %s230_s15 = int_to_ptr.vmem [resolvable:$true] %s229_s15 }
  0x4d   : > { %p1343_p8 = scmp.lt.u32.totalorder %s1336_s26, %s1781_s3 }
  0x4e   : > { %p1339_p5 = pnand %p1337_p13, %p1584_p0 }
  0x50   : > { %p1340_p3 = pneg %p1339_p5 }
  0x52   : > { %p1345_p10 = pnand %p1343_p8, %p1340_p3 }
  0x54   : > { %1348 = shalt.err (!%p1345_p10)
}
  0x55   : > { %s1349_s12 = scalar_lea.vmem %s230_s15, 1024  ;;  %p1357_p6 = scmp.lt.s32.totalorder %s230_s15, %s230_s15 }
  0x56   : > { %p1350_p1 = scmp.ne.s32.totalorder %s230_s15, %s1349_s12  ;;  %p1358_p7 = scmp.lt.s32.totalorder %s1349_s12, %s1349_s12 }
  0x58   : > { %p1352_p2 = pnand %p1350_p1, %p1584_p0  ;;  %p1359_p9 = por %p1358_p7, %p1357_p6 }
  0x5a   : > { %p1353_p4 = pneg %p1352_p2 }
  0x5c   : > { %p1360_p11 = pnand %p1359_p9, %p1353_p4 }
  0x5e   : > { %1363 = shalt.err (!%p1360_p11)
}
  0x5f   : > { %s1461_s24 = smov 64   ;;  %s1462_s25 = smov 4  }
  0x60   : > { %1147 = dma.hbm_to_vmem [thread:$0]  (!%p1570_p12), %s1781_s3, 1024, %s230_s15, [#allocation9], %s1461_s24, %s1461_s24, %s1462_s25  }
  0x61   : > { %p1006_p13 = scmp.ge.s32.totalorder %s1452_s23, 4 }
  0x63   : > { %242 = sbr.rel (%p1006_p13) target bundleno = 121 (0x79), region = 32 }
  0x6a   : > { %s246_s18 = sand.u32 1, %s1440_s20   ;;  %s1048_s13 = sshll.u32 %s1448_s22, 7 }
  0x6b   : > { %s1007_s14 = sshll.u32 %s246_s18, 6  ;;  %s259_s17 = scalar_lea.hbm %s1778_s0, %s1048_s13 }
  0x6c   : > { %p1800_p0 = scmp.ne.s32.totalorder %s1793_s27, 0  ;;  %s250_s26 = scalar_lea.vmem [#allocation2], %s1007_s14 }
  0x6d   : > { %s272_s28 = sshll.u32 %s250_s26, 4  ;;  %s1463_s9 = smov 512   ;;  %s273_s28 = int_to_ptr.vmem [resolvable:$true] %s272_s28 }
  0x6e   : > { %s1119_s15 = scalar_select %p1800_p0, [#allocation0], [#allocation13] }
  0x6f   : > { %1120 = sst [smem:[#allocation12]] (%p1800_p0), %s1463_s9  ;;  %s1464_s12 = smov 128  }
  0x70   : > { %s264_s8 = sld [smem:[%s1119_s15]]   ;;  %s1465_s24 = smov 2  }
  0x71   : > { %1121 = sst [smem:[#allocation12 + $0x1]] (%p1800_p0), %s1464_s12  ;;  %s1466_s25 = smov 64  }
  0x72   : > { %1122 = sst [smem:[#allocation12 + $0x2]] (%p1800_p0), %s1465_s24  ;;  %s1467_s1 = smov 4  }
  0x73   : > { %1123 = sst [smem:[#allocation12 + $0x3]] (%p1800_p0), %s1466_s25  ;;  %s247_s14 = scalar_lea.sflag [#allocation3], %s246_s18 }
  0x74   : > { %1124 = sst [smem:[#allocation12 + $0x4]] (%p1800_p0), %s1466_s25  ;;  %s1468_s16 = smov [#allocation11]  }
  0x75   : > { %1125 = sst [smem:[#allocation12 + $0x5]] (%p1800_p0), %s1467_s1 }
  0x76   : > { %s1010_s11 = sshll.u32 %s264_s8, 26 }
  0x77   : > { %s1011_s13 = sadd.s32 134217728, %s1010_s11 }
  0x78   : > { %1126 = dma.general (%p1800_p0), %s259_s17, 1024, %s273_s28, %s247_s14, %s1468_s16, [#allocation12], %s1011_s13, 0  }
  0x79 PF: > { %p1801_p12 = scmp.ne.s32.totalorder %s1796_s7, 0 }
  0x7a   : > { %s299_s10 = sand.u32 (!%p1801_p12), 1, %s1436_s19   ;;  %p1802_p5 = scmp.ne.s32.totalorder (!%p1801_p12), %s1795_s30, 0 }
  0x7b   : > { %297 = sbr.rel (%p1801_p12) target bundleno = 939 (0x3ab), region = 40  ;;  %s1013_s15 = sshll.u32 (!%p1801_p12), %s299_s10, 6 }
  0x7c   : > { %s300_s26 = scalar_lea.sflag (!%p1801_p12), [#allocation3], %s299_s10  ;;  %s1666_s9 = scalar_lea.vmem (!%p1801_p12), [#allocation2], %s1013_s15 }
  0x82   : > { %1415 = dma.done.wait (%p1802_p5), %s300_s26, 1024  }
  0x83   : > { %1417 = vsyncadd (%p1802_p5), %s300_s26, 4294966272  ;;  %p1803_p3 = scmp.ne.s32.totalorder %s1794_s29, 0 }
  0x85   : > { %1419 = dma.done.wait (%p1803_p3), [#allocation6], 640  }
  0x86   : > { %1421 = vsyncadd (%p1803_p3), [#allocation6], 4294966656 }
  0x87   : > { %1423 = dma.done.wait (%p1803_p3), [#allocation9], 1024  }
  0x88   : > { %1425 = vsyncadd (%p1803_p3), [#allocation9], 4294966272  ;;  %v1222_v0 = vld [vmem:[#allocation8] sm:$0xff]   ;;  %v1223_v1 = vld [vmem:[#allocation8 + $0x8] sm:$0xff]   ;;  %vm736_vm0 = vcmask 130112   ;;  %vm801_vm1 = vcmask 1041409  }
  0x89   : > { %1065 = vmatprep.subr.bf16.mxu0 %v1222_v0  ;;  %1097 = vmatprep.subr.bf16.mxu1 %v1222_v0  ;;  %v1224_v2 = vld [vmem:[#allocation8 + $0x10] sm:$0xff]   ;;  %v1225_v3 = vld [vmem:[#allocation8 + $0x18] sm:$0xff]   ;;  %v1226_v6 = vld [vmem:[#allocation8 + $0x20] sm:$0xff]   ;;  %vm803_vm2 = vcmask 1042434   ;;  %vm805_vm3 = vcmask 1043459   ;;  %vm807_vm4 = vcmask 1044484  }
  0x8a   : > { %1066 = vmatpush3.bf16.msra.mxu0 %v1222_v0  ;;  %1105 = vmatpush3.bf16.msra.mxu1 %v1222_v0  ;;  %v1230_v4 = vld [vmem:[%s1666_s9] sm:$0xff]   ;;  %v1227_v7 = vld [vmem:[#allocation8 + $0x28] sm:$0xff]   ;;  %v1228_v8 = vld [vmem:[#allocation8 + $0x30] sm:$0xff]   ;;  %vm809_vm5 = vcmask 1045509   ;;  %s1042_s30 = sshll.u32 %s1444_s21, 3  ;;  %vm811_vm6 = vcmask 1046534  }
  0x8b   : > { %1067 = vmatprep.subr.bf16.mxu0 %v1223_v1  ;;  %1098 = vmatprep.subr.bf16.mxu1 %v1223_v1  ;;  %v1231_v5 = vld [vmem:[%s1666_s9 + $0x20] sm:$0xff]   ;;  %v1232_v10 = vld [vmem:[%s1666_s9 + $0x8] sm:$0xff]   ;;  %v1234_v12 = vld [vmem:[%s1666_s9 + $0x10] sm:$0xff]   ;;  %vm813_vm7 = vcmask 1047559   ;;  %vm818_vm8 = vcmask 130048   ;;  %s817_s7 = scalar_lea.vmem [#allocation10], %s1042_s30 }
  0x8c   : > { %1081 = vmatprep.mubr.bf16.mxu0 %v1230_v4  ;;  %1089 = vmatprep.mubr.bf16.mxu1 %v1231_v5  ;;  %v1229_v9 = vld [vmem:[#allocation8 + $0x38] sm:$0xff]   ;;  %v1233_v11 = vld [vmem:[%s1666_s9 + $0x28] sm:$0xff]   ;;  %v1236_v13 = vld [vmem:[%s1666_s9 + $0x30] sm:$0xff]   ;;  %p1043_p8 = scmp.ne.s32.totalorder %s1444_s21, 3 }
  0x8d   : > { %v1235_v14 = vld [vmem:[%s1666_s9 + $0x18] sm:$0xff]   ;;  %v1034_v16 = vld [vmem:[#allocation7 + $0x1] ss:$0 sm:$0xff]  ;;  %v1038_v17 = vld [vmem:[#allocation7 + $0x5] ss:$0 sm:$0xff] }
  0x8e   : > { %1068 = vmatpush3.bf16.msra.mxu0 %v1223_v1  ;;  %1106 = vmatpush3.bf16.msra.mxu1 %v1223_v1  ;;  %v1237_v15 = vld [vmem:[%s1666_s9 + $0x38] sm:$0xff]   ;;  %v1033_v18 = vld [vmem:[#allocation7] ss:$0 sm:$0xff]  ;;  %v1037_v28 = vld [vmem:[#allocation7 + $0x4] ss:$0 sm:$0xff] }
  0x8f   : > { %1069 = vmatprep.subr.bf16.mxu0 %v1224_v2  ;;  %1099 = vmatprep.subr.bf16.mxu1 %v1224_v2  ;;  %v1036_v40 = vld [vmem:[#allocation7 + $0x3] ss:$0 sm:$0xff]  ;;  %v1691_v44 = vld [vmem:[%s1782_s4] ss:$0 sm:$0xff]  ;;  %v1035_v50 = vld [vmem:[#allocation7 + $0x2] ss:$0 sm:$0xff] }
  0x90   : > { %v1039_v57 = vld [vmem:[#allocation7 + $0x6] ss:$0 sm:$0xff]  ;;  %v1040_v63 = vld [vmem:[#allocation7 + $0x7] ss:$0 sm:$0xff] }
  0x92   : > { %1070 = vmatpush3.bf16.msra.mxu0 %v1224_v2  ;;  %1107 = vmatpush3.bf16.msra.mxu1 %v1224_v2 }
  0x93   : > { %1071 = vmatprep.subr.bf16.mxu0 %v1225_v3  ;;  %1100 = vmatprep.subr.bf16.mxu1 %v1225_v3 }
  0x96   : > { %1072 = vmatpush3.bf16.msra.mxu0 %v1225_v3  ;;  %1108 = vmatpush3.bf16.msra.mxu1 %v1225_v3 }
  0x97   : > { %1073 = vmatprep.subr.bf16.mxu0 %v1226_v6  ;;  %1101 = vmatprep.subr.bf16.mxu1 %v1226_v6 }
  0x9a   : > { %1074 = vmatpush3.bf16.msra.mxu0 %v1226_v6  ;;  %1109 = vmatpush3.bf16.msra.mxu1 %v1226_v6 }
  0x9b   : > { %1075 = vmatprep.subr.bf16.mxu0 %v1227_v7  ;;  %1102 = vmatprep.subr.bf16.mxu1 %v1227_v7 }
  0x9e   : > { %1076 = vmatpush3.bf16.msra.mxu0 %v1227_v7  ;;  %1110 = vmatpush3.bf16.msra.mxu1 %v1227_v7 }
  0x9f   : > { %1077 = vmatprep.subr.bf16.mxu0 %v1228_v8  ;;  %1103 = vmatprep.subr.bf16.mxu1 %v1228_v8 }
  0xa2   : > { %1078 = vmatpush3.bf16.msra.mxu0 %v1228_v8  ;;  %1111 = vmatpush3.bf16.msra.mxu1 %v1228_v8 }
  0xa3   : > { %1079 = vmatprep.subr.bf16.mxu0 %v1229_v9  ;;  %1104 = vmatprep.subr.bf16.mxu1 %v1229_v9 }
  0xa6   : > { %1080 = vmatpush3.bf16.msra.mxu0 %v1229_v9  ;;  %1112 = vmatpush3.bf16.msra.mxu1 %v1229_v9 }
  0xa9   : > { %1082 = vmatmul.mubr.bf16.vlgmr.msra.gmra.mrb[0].mxu0 %v1232_v10  ;;  %1090 = vmatmul.mubr.bf16.vlgmr.msra.gmra.mrb[0].mxu1 %v1233_v11 }
  0xaa   : > { %1085 = vmatprep.mubr.bf16.mxu0 %v1234_v12  ;;  %1093 = vmatprep.mubr.bf16.mxu1 %v1236_v13 }
  0xb1   : > { %1086 = vmatmul.mubr.bf16.gmra.mrb[4].mxu0 %v1235_v14  ;;  %1094 = vmatmul.mubr.bf16.gmra.mrb[4].mxu1 %v1237_v15 }
 0x17c   : > { %v1083_v19 = vpop.f32.mrb[0].mxu0  ;;  %v1091_v20 = vpop.f32.mrb[0].mxu1 }
 0x17d   : > { %v624_v21 = vadd.f32 %v1083_v19, %v1034_v16  ;;  %v632_v22 = vadd.f32 %v1091_v20, %v1038_v17  ;;  %v503_v23 = vpop.f32.mrb[1].mxu0  ;;  %v535_v24 = vpop.f32.mrb[1].mxu1 }
 0x17e   : > { %v622_v25 = vadd.f32 %v1033_v18, %v503_v23  ;;  %v1084_v26 = vpop.f32.mrb[2].mxu0  ;;  %v1092_v27 = vpop.f32.mrb[2].mxu1  ;;  %v630_v33 = vadd.f32 %v1037_v28, %v535_v24 }
 0x17f   : > { %1238 = vtanh.f32 %v624_v21  ;;  %v625_v29 = vadd.f32 %v1084_v26, %v1034_v16  ;;  %v506_v30 = vpop.f32.mrb[3].mxu0  ;;  %v538_v31 = vpop.f32.mrb[3].mxu1  ;;  %v633_v32 = vadd.f32 %v1092_v27, %v1038_v17 }
 0x180   : > { %1240 = vtanh.f32 %v632_v22  ;;  %v631_v36 = vadd.f32 %v1037_v28, %v538_v31  ;;  %v623_v39 = vadd.f32 %v1033_v18, %v506_v30  ;;  %v725_v28 = vlaneseq }
 0x181   : > { %1242 = vtanh.f32 %v622_v25 }
 0x182   : > { %1244 = vtanh.f32 %v625_v29  ;;  %v726_v31 = vand.u32 127, %v725_v28 }
 0x183   : > { %1246 = vtanh.f32 %v633_v32 }
 0x184   : > { %v1087_v34 = vpop.f32.mrb[4].mxu0  ;;  %v1095_v35 = vpop.f32.mrb[4].mxu1  ;;  %1248 = vtanh.f32 %v630_v33  ;;  %v731_v33 = vadd.s32 4294967288, %v726_v31 }
 0x185   : > { %v519_v37 = vpop.f32.mrb[5].mxu0  ;;  %v551_v38 = vpop.f32.mrb[5].mxu1  ;;  %1250 = vtanh.f32 %v631_v36  ;;  %v628_v49 = vadd.f32 %v1087_v34, %v1036_v40  ;;  %v636_v6 = vadd.f32 %v1095_v35, %v1040_v63  ;;  %v728_v34 = vshrl.u32 %v725_v28, 7 }
 0x186   : > { %v1088_v41 = vpop.f32.mrb[6].mxu0  ;;  %v1096_v42 = vpop.f32.mrb[6].mxu1  ;;  %1252 = vtanh.f32 %v623_v39  ;;  %v626_v56 = vadd.f32 %v1035_v50, %v519_v37  ;;  %v634_v0 = vadd.f32 %v1039_v57, %v551_v38 }
 0x187   : > { %v522_v43 = vpop.f32.mrb[7].mxu0  ;;  %v554_v45 = vpop.f32.mrb[7].mxu1  ;;  %v629_v47 = vadd.f32 %v1088_v41, %v1036_v40  ;;  %v637_v5 = vadd.f32 %v1096_v42, %v1040_v63  ;;  %v734_v37 = vsub.s32 %v731_v33, %v728_v34  ;;  %v729_v38 = vsub.s32 %v726_v31, %v728_v34 }
 0x188   : > { %v627_v55 = vadd.f32 %v1035_v50, %v522_v43  ;;  %v635_v62 = vadd.f32 %v1039_v57, %v554_v45 }
 0x189   : > { %v1239_v46 = vpop.eup %1238  ;;  %1254 = vtanh.f32 %v629_v47 }
 0x18a   : > { %v1241_v48 = vpop.eup %1240  ;;  %v663_v51 = vmul.f32 %v1239_v46, %v1691_v44  ;;  %1256 = vtanh.f32 %v628_v49 }
 0x18b   : > { %v671_v52 = vmul.f32 %v1241_v48, %v1691_v44  ;;  %v1243_v53 = vpop.eup %1242  ;;  %1258 = vtanh.f32 %v627_v55 }
 0x18c   : > { %681 = vadd.xlane.f32.xlu1 %v663_v51  ;;  %v1245_v54 = vpop.eup %1244  ;;  %v661_v60 = vmul.f32 %v1243_v53, %v1691_v44  ;;  %1260 = vtanh.f32 %v626_v56 }
 0x18d   : > { %697 = vadd.xlane.f32.xlu0 %v671_v52  ;;  %v664_v58 = vmul.f32 %v1245_v54, %v1691_v44  ;;  %v1247_v59 = vpop.eup %1246  ;;  %1262 = vtanh.f32 %v635_v62 }
 0x18e   : > { %v1249_v61 = vpop.eup %1248  ;;  %v672_v1 = vmul.f32 %v1247_v59, %v1691_v44  ;;  %1264 = vtanh.f32 %v634_v0 }
 0x18f   : > { %v1251_v2 = vpop.eup %1250  ;;  %v669_v3 = vmul.f32 %v1249_v61, %v1691_v44  ;;  %1266 = vtanh.f32 %v637_v5 }
 0x190   : > { %683 = vadd.xlane.f32.xlu1 %v664_v58  ;;  %v1253_v4 = vpop.eup %1252  ;;  %v670_v7 = vmul.f32 %v1251_v2, %v1691_v44  ;;  %1268 = vtanh.f32 %v636_v6 }
 0x191   : > { %677 = vadd.xlane.f32.xlu0 %v661_v60  ;;  %v662_v9 = vmul.f32 %v1253_v4, %v1691_v44 }
 0x193   : > { %v1255_v8 = vpop.eup %1254 }
 0x194   : > { %699 = vadd.xlane.f32.xlu1 %v672_v1  ;;  %v1257_v10 = vpop.eup %1256  ;;  %v668_v11 = vmul.f32 %v1255_v8, %v1691_v44 }
 0x195   : > { %693 = vadd.xlane.f32.xlu0 %v669_v3  ;;  %v1259_v12 = vpop.eup %1258  ;;  %v667_v13 = vmul.f32 %v1257_v10, %v1691_v44 }
 0x196   : > { %v1261_v14 = vpop.eup %1260  ;;  %v666_v15 = vmul.f32 %v1259_v12, %v1691_v44 }
 0x197   : > { %v1263_v16 = vpop.eup %1262  ;;  %v665_v17 = vmul.f32 %v1261_v14, %v1691_v44 }
 0x198   : > { %695 = vadd.xlane.f32.xlu1 %v670_v7  ;;  %v1265_v18 = vpop.eup %1264  ;;  %v674_v19 = vmul.f32 %v1263_v16, %v1691_v44 }
 0x199   : > { %679 = vadd.xlane.f32.xlu0 %v662_v9  ;;  %v1267_v20 = vpop.eup %1266  ;;  %v673_v21 = vmul.f32 %v1265_v18, %v1691_v44 }
 0x19a   : > { %v1269_v22 = vpop.eup %1268  ;;  %v676_v23 = vmul.f32 %v1267_v20, %v1691_v44 }
 0x19b   : > { %v675_v24 = vmul.f32 %v1269_v22, %v1691_v44  ;;  %v829_v22 = vld [vmem:[#allocation5 + $0x8] sm:$0xff] (!%p1043_p8) }
 0x19c   : > { %691 = vadd.xlane.f32.xlu1 %v668_v11  ;;  %vm833_vm12 = vcmp.ne.f32.partialorder (!%p1043_p8), %v829_v22, 0.0 }
 0x19d   : > { %689 = vadd.xlane.f32.xlu0 %v667_v13 }
 0x1a0   : > { %687 = vadd.xlane.f32.xlu1 %v666_v15  ;;  %v830_v15 = vld [vmem:[#allocation5 + $0x10] sm:$0xff] (!%p1043_p8) }
 0x1a1   : > { %685 = vadd.xlane.f32.xlu0 %v665_v17  ;;  %vm834_vm9 = vcmp.ne.f32.partialorder (!%p1043_p8), %v830_v15, 0.0  ;;  %v828_v17 = vld [vmem:[#allocation5] sm:$0xff] (!%p1043_p8) }
 0x1a2   : > { %vm832_vm10 = vcmp.ne.f32.partialorder (!%p1043_p8), %v828_v17, 0.0 }
 0x1a4   : > { %703 = vadd.xlane.f32.xlu1 %v674_v19  ;;  %v831_v19 = vld [vmem:[#allocation5 + $0x18] sm:$0xff] (!%p1043_p8) }
 0x1a5   : > { %701 = vadd.xlane.f32.xlu0 %v673_v21  ;;  %vm835_vm11 = vcmp.ne.f32.partialorder (!%p1043_p8), %v831_v19, 0.0 }
 0x1a8   : > { %707 = vadd.xlane.f32.xlu1 %v676_v23 }
 0x1a9   : > { %705 = vadd.xlane.f32.xlu0 %v675_v24 }
 0x219   : > { %v682_v25 = vpop.xlane.xlu1 %681 }
 0x21a   : > { %v698_v26 = vpop.xlane.xlu0 %697  ;;  %v741_v44 = vrot.slane %v682_v25, %v729_v38 }
 0x21b   : > { %v777_v63 = vrot.slane %v698_v26, %v729_v38 }
 0x21d   : > { %v684_v27 = vpop.xlane.xlu1 %683 }
 0x21e   : > { %v678_v29 = vpop.xlane.xlu0 %677  ;;  %v745_v43 = vrot.slane %v684_v27, %v734_v37 }
 0x21f   : > { %v730_v42 = vrot.slane %v678_v29, %v729_v38 }
 0x220   : > { %v746_v53 = vsel %vm736_vm0, %v745_v43, %v741_v44 }
 0x221   : > { %v700_v30 = vpop.xlane.xlu1 %699 }
 0x222   : > { %v694_v32 = vpop.xlane.xlu0 %693  ;;  %v781_v55 = vrot.slane %v700_v30, %v734_v37 }
 0x223   : > { %v768_v54 = vrot.slane %v694_v32, %v729_v38 }
 0x224   : > { %v782_v4 = vsel %vm736_vm0, %v781_v55, %v777_v63 }
 0x225   : > { %v696_v35 = vpop.xlane.xlu1 %695 }
 0x226   : > { %v680_v36 = vpop.xlane.xlu0 %679  ;;  %v772_v51 = vrot.slane %v696_v35, %v734_v37 }
 0x227   : > { %v735_v40 = vrot.slane %v680_v36, %v734_v37 }
 0x228   : > { %v773_v0 = vsel %vm736_vm0, %v772_v51, %v768_v54 }
 0x229   : > { %v692_v39 = vpop.xlane.xlu1 %691  ;;  %v737_v46 = vsel %vm736_vm0, %v735_v40, %v730_v42 }
 0x22a   : > { %v690_v41 = vpop.xlane.xlu0 %689  ;;  %v763_v48 = vrot.slane %v692_v39, %v734_v37  ;;  %v802_v56 = vsel %vm801_vm1, %v746_v53, %v737_v46 }
 0x22b   : > { %v759_v47 = vrot.slane %v690_v41, %v729_v38 }
 0x22d   : > { %v688_v45 = vpop.xlane.xlu1 %687  ;;  %v764_v59 = vsel %vm736_vm0, %v763_v48, %v759_v47 }
 0x22e   : > { %v686_v49 = vpop.xlane.xlu0 %685  ;;  %v754_v50 = vrot.slane %v688_v45, %v734_v37 }
 0x22f   : > { %v750_v52 = vrot.slane %v686_v49, %v729_v38 }
 0x231   : > { %v755_v57 = vsel %vm736_vm0, %v754_v50, %v750_v52  ;;  %v704_v58 = vpop.xlane.xlu1 %703 }
 0x232   : > { %v804_v60 = vsel %vm803_vm2, %v755_v57, %v802_v56  ;;  %v702_v61 = vpop.xlane.xlu0 %701  ;;  %v790_v62 = vrot.slane %v704_v58, %v734_v37 }
 0x233   : > { %v806_v1 = vsel %vm805_vm3, %v764_v59, %v804_v60  ;;  %v786_v2 = vrot.slane %v702_v61, %v729_v38 }
 0x234   : > { %v808_v3 = vsel %vm807_vm4, %v773_v0, %v806_v1 }
 0x235   : > { %v708_v5 = vpop.xlane.xlu1 %707  ;;  %v810_v6 = vsel %vm809_vm5, %v782_v4, %v808_v3  ;;  %v791_v7 = vsel %vm736_vm0, %v790_v62, %v786_v2  ;;  %823 = sbr.rel (%p1043_p8) target bundleno = 913 (0x391), region = 60 }
 0x236   : > { %v706_v8 = vpop.xlane.xlu0 %705  ;;  %v799_v9 = vrot.slane %v708_v5, %v734_v37  ;;  %v812_v11 = vsel %vm811_vm6, %v791_v7, %v810_v6 }
 0x237   : > { %v795_v10 = vrot.slane %v706_v8, %v729_v38 }
 0x239   : > { %v800_v12 = vsel %vm736_vm0, %v799_v9, %v795_v10 }
 0x23a   : > { %v814_v13 = vsel %vm813_vm7, %v800_v12, %v812_v11 }
 0x23b   : > { %819 = vst.msk [vmem:[%s817_s7] sm:$0xff] %vm818_vm8, %v814_v13 }
 0x242   : > { %v826_v14 = vld [vmem:[#allocation10 + $0x10] sm:$0xff]  ;;  %v824_v16 = vld [vmem:[#allocation10] sm:$0xff]  ;;  %v827_v18 = vld [vmem:[#allocation10 + $0x18] sm:$0xff] }
 0x243   : > { %v838_v20 = vsel %vm834_vm9, %v826_v14, -1e+18  ;;  %v825_v21 = vld [vmem:[#allocation10 + $0x8] sm:$0xff]  ;;  %v836_v24 = vsel %vm832_vm10, %v824_v16, -1e+18 }
 0x244   : > { %v846_v23 = vsel %vm818_vm8, %v838_v20, -inf  ;;  %v839_v25 = vsel %vm835_vm11, %v827_v18, -1e+18  ;;  %v840_v26 = vsel %vm818_vm8, %v836_v24, -inf  ;;  %v837_v27 = vsel %vm833_vm12, %v825_v21, -1e+18 }
 0x245   : > { %847 = vmax.xlane.f32.xlu1 %v846_v23  ;;  %841 = vmax.xlane.f32.xlu0 %v840_v26  ;;  %v849_v28 = vsel %vm818_vm8, %v839_v25, -inf  ;;  %v843_v29 = vsel %vm818_vm8, %v837_v27, -inf }
 0x249   : > { %850 = vmax.xlane.f32.xlu1 %v849_v28  ;;  %844 = vmax.xlane.f32.xlu0 %v843_v29 }
 0x2d2   : > { %v848_v30 = vpop.xlane.xlu1 %847  ;;  %v842_v31 = vpop.xlane.xlu0 %841 }
 0x2d6   : > { %v851_v32 = vpop.xlane.xlu1 %850  ;;  %v845_v34 = vpop.xlane.xlu0 %844 }
 0x2d7   : > { %v853_v33 = vmax.f32 %v848_v30, %v851_v32  ;;  %v852_v35 = vmax.f32 %v842_v31, %v845_v34 }
 0x2d9   : > { %v854_v36 = vmax.f32 %v852_v35, %v853_v33 }
 0x2db   : > { %v855_v37 = vsub.f32 %v836_v24, %v854_v36  ;;  %v856_v38 = vsub.f32 %v837_v27, %v854_v36  ;;  %v857_v39 = vsub.f32 %v838_v20, %v854_v36  ;;  %v858_v40 = vsub.f32 %v839_v25, %v854_v36 }
 0x2dd   : > { %v859_v41 = vmul.f32 1.442695, %v855_v37  ;;  %v861_v42 = vmul.f32 1.442695, %v856_v38  ;;  %v863_v43 = vmul.f32 1.442695, %v857_v39 }
 0x2de   : > { %v865_v44 = vmul.f32 1.442695, %v858_v40 }
 0x2df   : > { %1270 = vpow2.f32 %v861_v42 }
 0x2e0   : > { %1272 = vpow2.f32 %v859_v41 }
 0x2e1   : > { %1274 = vpow2.f32 %v865_v44 }
 0x2e2   : > { %1276 = vpow2.f32 %v863_v43 }
 0x2e9   : > { %v1271_v45 = vpop.eup %1270 }
 0x2ea   : > { %v1273_v46 = vpop.eup %1272  ;;  %v870_v47 = vsel %vm818_vm8, %v1271_v45, 0.0 }
 0x2eb   : > { %v1275_v48 = vpop.eup %1274  ;;  %871 = vadd.xlane.f32.xlu1 %v870_v47  ;;  %v867_v49 = vsel %vm818_vm8, %v1273_v46, 0.0 }
 0x2ec   : > { %v1277_v50 = vpop.eup %1276  ;;  %868 = vadd.xlane.f32.xlu0 %v867_v49  ;;  %v876_v51 = vsel %vm818_vm8, %v1275_v48, 0.0 }
 0x2ed   : > { %v873_v52 = vsel %vm818_vm8, %v1277_v50, 0.0 }
 0x2ef   : > { %877 = vadd.xlane.f32.xlu1 %v876_v51 }
 0x2f0   : > { %874 = vadd.xlane.f32.xlu0 %v873_v52 }
 0x378   : > { %v872_v53 = vpop.xlane.xlu1 %871 }
 0x379   : > { %v869_v54 = vpop.xlane.xlu0 %868 }
 0x37a   : > { %v879_v55 = vadd.f32 %v872_v53, %v869_v54 }
 0x37c   : > { %v878_v58 = vpop.xlane.xlu1 %877 }
 0x37d   : > { %v875_v56 = vpop.xlane.xlu0 %874 }
 0x37e   : > { %v880_v57 = vadd.f32 %v879_v55, %v875_v56 }
 0x380   : > { %v881_v59 = vadd.f32 %v880_v57, %v878_v58 }
 0x382   : > { %1278 = vrcp.f32 %v881_v59 }
 0x38c   : > { %v1279_v60 = vpop.eup %1278 }
 0x38d   : > { %v883_v61 = vmul.f32 %v1279_v60, %v1273_v46  ;;  %v884_v62 = vmul.f32 %v1279_v60, %v1271_v45  ;;  %v885_v63 = vmul.f32 %v1279_v60, %v1277_v50  ;;  %v886_v0 = vmul.f32 %v1279_v60, %v1275_v48 }
 0x38f   : > { %887 = vst.msk [vmem:[#allocation10] sm:$0xff] %vm818_vm8, %v883_v61  ;;  %888 = vst.msk [vmem:[#allocation10 + $0x8] sm:$0xff] %vm818_vm8, %v884_v62 }
 0x390   : > { %889 = vst.msk [vmem:[#allocation10 + $0x10] sm:$0xff] %vm818_vm8, %v885_v63  ;;  %890 = vst.msk [vmem:[#allocation10 + $0x18] sm:$0xff] %vm818_vm8, %v886_v0 }
 0x391 PF: > { %s1804_s21 = sadd.s32 4294967295, %s1452_s23   ;;  %s1469_s17 = smov [#allocation10]  }
 0x392   : > { %p1734_p10 = scmp.eq.s32.totalorder %s1804_s21, 3  ;;  %s899_s28 = sshll.u32 %s1469_s17, 4  ;;  %s900_s28 = int_to_ptr.vmem [resolvable:$true] %s899_s28 }
 0x393   : > { %s1364_s8 = scalar_lea.vmem %s900_s28, 512  ;;  %p1371_p6 = scmp.lt.s32.totalorder %s900_s28, %s900_s28 }
 0x394   : > { %p1365_p1 = scmp.ne.s32.totalorder %s900_s28, %s1364_s8  ;;  %p1372_p7 = scmp.lt.s32.totalorder %s1364_s8, %s1364_s8 }
 0x396   : > { %p1366_p2 = pnand %p1365_p1, %p1734_p10  ;;  %p1373_p9 = por %p1372_p7, %p1371_p6 }
 0x398   : > { %p1367_p4 = pneg %p1366_p2 }
 0x39a   : > { %p1374_p11 = pnand %p1373_p9, %p1367_p4 }
 0x39c   : > { %1377 = shalt.err (!%p1374_p11)
}
 0x39d   : > { %s1378_s25 = scalar_lea.hbm %s1783_s5, 512 }
 0x39e   : > { %p1379_p13 = scmp.ne.s32.totalorder %s1783_s5, %s1378_s25  ;;  %p1384_p5 = scmp.lt.u32.totalorder %s1378_s25, %s1783_s5 }
 0x3a0   : > { %p1380_p0 = pnand %p1379_p13, %p1734_p10 }
 0x3a2   : > { %p1381_p12 = pneg %p1380_p0 }
 0x3a4   : > { %p1386_p3 = pnand %p1384_p5, %p1381_p12 }
 0x3a6   : > { %1389 = shalt.err (!%p1386_p3)
}
 0x3a7   : > { %s1470_s16 = smov 128   ;;  %s1471_s10 = smov 8  }
 0x3a8   : > { %1135 = dma.vmem_to_hbm [thread:$0]  (%p1734_p10), %s900_s28, 512, %s1783_s5, [#allocation4], %s1470_s16, %s1470_s16, %s1471_s10  }
 0x3a9   : > { %1427 = dma.done.wait (%p1734_p10), [#allocation4], 512  }
 0x3aa   : > { %1429 = vsyncadd (%p1734_p10), [#allocation4], 4294966784 }
 0x3ab PF: > { %s21_s23 = sadd.s32 1, %s1452_s23   ;;  %s1806_s9 = sld [smem:[#allocation18_spill]] }
 0x3ac   : > { %p18_p8 = scmp.ge.s32.totalorder %s21_s23, 6   ;;  %s1807_s18 = smov %s1436_s19 }
 0x3ad   : > { %s1808_s19 = smov %s1440_s20  ;;  %s1809_s20 = smov %s1560_s6 }
 0x3ae   : > { %s1810_s21 = smov %s1448_s22  ;;  %20 = sbr.rel (!%p18_p8) target bundleno = 9 (0x9), region = 102 }
 0x3b1   : > { %s1811_s22 = smov %s1806_s9 }
 0x3b5   :  { %915 = vsyncpa [#allocation3], 1 }
 0x3b6   :  { %917 = vsyncpa [#allocation3 + $0x1], 1 }
 0x3b7   :  { %918 = vsyncpa [#allocation6], 1 }
 0x3b8   :  { %919 = vsyncpa [#allocation9], 1 }
 0x3b9   :  { %920 = vsyncpa [#allocation4], 1 }
 0x3ba   :  { %922 = vsyncpa [#allocation4 + $0x1], 1 }

</bundles_post_ra>
